<compile_context>
chip_gen: v7x
topology: tpu7x:2x2x1
jax: 0.10.0
libtpu: 0.0.40
codegen_flags: <defaults>
</compile_context>

<pallas_src>
import math

import jax
import jax.numpy as jnp
import numpy as np
from jax.experimental import pallas as pl
from jax.experimental.pallas import tpu as pltpu


def _drop_path_kernel(scale_ref, x_ref, o_ref):
    # scale_ref: (TB, 1) f32, broadcast along lanes; multiply in the x dtype.
    o_ref[...] = x_ref[...] * scale_ref[...].astype(o_ref.dtype)


def _round_up(n: int, m: int) -> int:
    return ((n + m - 1) // m) * m


def _largest_tile(n: int, step: int, cap: int) -> int:
    """Largest multiple of `step` that divides `n` and is <= max(cap, step)."""
    t = max(step, min(n, (cap // step) * step))
    while n % t:
        t -= step
    return t


def drop_path(x, drop_prob: float = 0.0, training: bool = False, seed: int = 0):
    """Pallas equivalent of the PyTorch drop_path function (forward)."""
    if drop_prob == 0.0 or not training:
        return x
    keep_prob = 1.0 - float(drop_prob)

    B = x.shape[0]
    L = int(np.prod(x.shape[1:])) if x.ndim > 1 else 1

    # Per-sample drop decision, computed once on (B, 1) scalars in the wrapper.
    key = jax.random.PRNGKey(seed)
    u = jax.random.uniform(key, (B, 1), dtype=jnp.float32)
    scale = jnp.floor(jnp.float32(keep_prob) + u) * jnp.float32(1.0 / keep_prob)

    x2 = x.reshape(B, L)

    itemsize = jnp.dtype(x.dtype).itemsize
    sub = {4: 8, 2: 16, 1: 32}.get(itemsize, 8)  # sublane packing per dtype
    LANE = 128

    Bp = _round_up(B, sub)
    Lp = _round_up(L, LANE)
    if (Bp, Lp) != (B, L):
        x2 = jnp.pad(x2, ((0, Bp - B), (0, Lp - L)))
        scale = jnp.pad(scale, ((0, Bp - B), (0, 0)), constant_values=1.0)

    # Tile sizes: sublane/lane dense, each buffer capped around ~2 MiB so
    # double-buffered in+out stays well under every generation's VMEM budget
    # (including v7x's 64 MiB physical / 32 MiB default scoped limit).
    TB = _largest_tile(Bp, sub, 256)
    tl_cap = max(LANE, (2 * 1024 * 1024) // (TB * itemsize))
    TL = _largest_tile(Lp, LANE, tl_cap)
    grid = (Bp // TB, Lp // TL)

    out = pl.pallas_call(
        _drop_path_kernel,
        out_shape=jax.ShapeDtypeStruct((Bp, Lp), x.dtype),
        grid=grid,
        in_specs=[
            pl.BlockSpec((TB, 1), lambda i, j: (i, 0)),
            pl.BlockSpec((TB, TL), lambda i, j: (i, j)),
        ],
        out_specs=pl.BlockSpec((TB, TL), lambda i, j: (i, j)),
        compiler_params=pltpu.CompilerParams(
            dimension_semantics=("parallel", "parallel"),
        ),
        input_output_aliases={1: 0},  # elementwise: reuse the padded x buffer
        cost_estimate=pl.CostEstimate(
            flops=Bp * Lp,
            transcendentals=0,
            bytes_accessed=2 * Bp * Lp * itemsize + Bp * 4,
        ),
    )(scale, x2)

    if (Bp, Lp) != (B, L):
        out = out[:B, :L]
    return out.reshape(x.shape)


class DropPath:
    """Mirror of the PyTorch DropPath module (no parameters)."""

    def __init__(self, drop_prob=None):
        self.drop_prob = drop_prob
        self.training = True

    def __call__(self, x, seed: int = 0):
        p = 0.0 if self.drop_prob is None else float(self.drop_prob)
        return drop_path(x, p, self.training, seed=seed)


if __name__ == "__main__":
    key = jax.random.PRNGKey(0)
    # Small NCHW-style input: batch=2, channels=4, spatial=16x16
    x = jax.random.normal(key, (2, 4, 16, 16), dtype=jnp.float32)

    mod = DropPath(drop_prob=0.2)
    mod.training = True
    y = jax.block_until_ready(mod(x, seed=0))

    # Sanity: each batch row is either all-zero or x / keep_prob (elementwise).
    keep_prob = 0.8
    yn = np.asarray(y)
    xn = np.asarray(x)
    for b in range(xn.shape[0]):
        row = yn[b]
        ok_drop = np.allclose(row, 0.0)
        ok_keep = np.allclose(row, xn[b] / keep_prob, rtol=1e-5, atol=1e-5)
        assert ok_drop or ok_keep, "row is neither dropped nor kept/scaled"

    # Eval / drop_prob=0 path returns x unchanged.
    mod_eval = DropPath(drop_prob=0.2)
    mod_eval.training = False
    y_eval = jax.block_until_ready(mod_eval(x))
    assert np.allclose(np.asarray(y_eval), xn)

    print("KERNEL_OK")
</pallas_src>

<mosaic_0001>
module attributes {stable_mosaic.version = 11 : i64} {
  func.func @_drop_path_kernel(%arg0: i32, %arg1: i32, %arg2: memref<8x1xf32, #tpu.memory_space<vmem>>, %arg3: memref<8x1024xf32, #tpu.memory_space<vmem>>, %arg4: memref<8x1024xf32, #tpu.memory_space<vmem>>) attributes {dimension_semantics = [#tpu.dimension_semantics<parallel>, #tpu.dimension_semantics<parallel>], iteration_bounds = array<i64: 1, 1>, scalar_prefetch = 0 : i64, scratch_operands = 0 : i64, tpu.core_type = #tpu.core_type<tc>, window_params = [{transform_indices = @transform_0, window_bounds = array<i64: 8, 1>}, {transform_indices = @transform_1, window_bounds = array<i64: 8, 1024>}, {transform_indices = @transform_2, window_bounds = array<i64: 8, 1024>}]} {
    %c0 = arith.constant 0 : index
    %c0_0 = arith.constant 0 : index
    %0 = vector.load %arg3[%c0, %c0_0] : memref<8x1024xf32, #tpu.memory_space<vmem>>, vector<8x1024xf32>
    %c0_1 = arith.constant 0 : index
    %c0_2 = arith.constant 0 : index
    %1 = vector.load %arg2[%c0_1, %c0_2] : memref<8x1xf32, #tpu.memory_space<vmem>>, vector<8x1xf32>
    %2 = vector.broadcast %1 : vector<8x1xf32> to vector<8x1024xf32>
    %3 = arith.mulf %0, %2 : vector<8x1024xf32>
    %c0_3 = arith.constant 0 : index
    %c0_4 = arith.constant 0 : index
    %4 = vector.load %arg4[%c0_3, %c0_4] : memref<8x1024xf32, #tpu.memory_space<vmem>>, vector<8x1024xf32>
    tpu.vector_store %arg4[%c0_3, %c0_4], %3 {strides = array<i32>} : memref<8x1024xf32, #tpu.memory_space<vmem>>, vector<8x1024xf32>,
    return
  }
  func.func @transform_0(%arg0: i32, %arg1: i32) -> (i32, i32) {
    %c0_i32 = arith.constant 0 : i32
    %c0_i32_0 = arith.constant 0 : i32
    return %arg0, %c0_i32 : i32, i32
  }
  func.func @transform_1(%arg0: i32, %arg1: i32) -> (i32, i32) {
    %c0_i32 = arith.constant 0 : i32
    return %arg0, %arg1 : i32, i32
  }
  func.func @transform_2(%arg0: i32, %arg1: i32) -> (i32, i32) {
    %c0_i32 = arith.constant 0 : i32
    return %arg0, %arg1 : i32, i32
  }
}

</mosaic_0001>

<bundles_post_ra>
// kernel: tpu_custom_call.1
= control target key start
LH: loop header
LB: loop body
LE: loop exit
PB: predicated region body
PF: predicated region fallthrough
CT: control target
= control target key end

     0   :  { %7 = vsyncpa [#allocation3], 0  ;;  %s166_s0 = inlined_call_operand.vmem [shape: f32[8,1], index: 0, kind: input, shape index: {}]   ;;  %s167_s1 = inlined_call_operand.hbm [shape: f32[8,1024], index: 1, kind: input, shape index: {}, may-alias: {1,2}]   ;;  %s168_s2 = inlined_call_operand.hbm [shape: f32[8,1024], index: 2, kind: output, shape index: {}, may-alias: {1,2}]  }
   0x1   :  { %8 = vsyncpa [#allocation4], 0  ;;  %s121_s9 = smov [#allocation2]   ;;  %s73_s13 = scalar_lea.hbm %s167_s1, 1024 }
   0x2   :  { %s17_s10 = sshll.u32 %s121_s9, 4  ;;  %p74_p0 = scmp.ne.s32.totalorder %s167_s1, %s73_s13  ;;  %s18_s10 = int_to_ptr.vmem [resolvable:$true] %s17_s10 }
   0x3   :  { %p77_p1 = scmp.lt.u32.totalorder %s73_s13, %s167_s1 }
   0x5   :  { %p79_p2 = pnand %p77_p1, %p74_p0 }
   0x7   :  { %82 = shalt.err (!%p79_p2)
}
   0x8   :  { %s83_s18 = scalar_lea.vmem %s18_s10, 1024  ;;  %p88_p4 = scmp.lt.s32.totalorder %s18_s10, %s18_s10 }
   0x9   :  { %p84_p3 = scmp.ne.s32.totalorder %s18_s10, %s83_s18  ;;  %p89_p5 = scmp.lt.s32.totalorder %s83_s18, %s83_s18 }
   0xb   :  { %p90_p6 = por %p89_p5, %p88_p4 }
   0xd   :  { %p91_p7 = pnand %p90_p6, %p84_p3 }
   0xf   :  { %94 = shalt.err (!%p91_p7)
}
  0x10   :  { %20 = dma.hbm_to_vmem [thread:$0]  %s167_s1, 1024, %s18_s10, [#allocation3]  }
  0x11   :  { %117 = dma.done.wait [#allocation3], 1024  }
  0x12   :  { %118 = vsyncadd [#allocation3], 4294966272  ;;  %v122_v0 = vmov 0   ;;  %v32_v1 = vld [vmem:[%s166_s0] sm:$0xff]  ;;  %v25_v3 = vld [vmem:[#allocation2 + $0x8] sm:$0xff]  ;;  %s123_s23 = smov [#allocation5]  }
  0x13   :  { %72 = vset.pattern.permute.xlu0 %v122_v0  ;;  %v24_v2 = vld [vmem:[#allocation2] sm:$0xff]  ;;  %v26_v4 = vld [vmem:[#allocation2 + $0x10] sm:$0xff]  ;;  %v27_v5 = vld [vmem:[#allocation2 + $0x18] sm:$0xff]  ;;  %s60_s24 = sshll.u32 %s123_s23, 4  ;;  %s61_s24 = int_to_ptr.vmem [resolvable:$true] %s60_s24 }
  0x14   :  { %35 = vperm.xlu0 %72, %v32_v1   ;;  %v28_v6 = vld [vmem:[#allocation2 + $0x20] sm:$0xff]  ;;  %v29_v7 = vld [vmem:[#allocation2 + $0x28] sm:$0xff]  ;;  %v30_v8 = vld [vmem:[#allocation2 + $0x30] sm:$0xff]  ;;  %s95_s0 = scalar_lea.vmem %s61_s24, 1024  ;;  %p100_p9 = scmp.lt.s32.totalorder %s61_s24, %s61_s24 }
  0x15   :  { %v31_v9 = vld [vmem:[#allocation2 + $0x38] sm:$0xff]  ;;  %p96_p8 = scmp.ne.s32.totalorder %s61_s24, %s95_s0  ;;  %p101_p10 = scmp.lt.s32.totalorder %s95_s0, %s95_s0 }
  0x17   :  { %p102_p11 = por %p101_p10, %p100_p9 }
  0x19   :  { %p103_p12 = pnand %p102_p11, %p96_p8 }
  0x93   :  { %v36_v10 = vpop.permute.xlu0 %35 }
  0x94   :  { %v38_v11 = vmul.f32 %v36_v10, %v24_v2  ;;  %v39_v12 = vmul.f32 %v36_v10, %v25_v3  ;;  %v40_v13 = vmul.f32 %v36_v10, %v26_v4  ;;  %v41_v14 = vmul.f32 %v36_v10, %v27_v5 }
  0x95   :  { %v42_v15 = vmul.f32 %v36_v10, %v28_v6  ;;  %v43_v16 = vmul.f32 %v36_v10, %v29_v7  ;;  %v44_v17 = vmul.f32 %v36_v10, %v30_v8  ;;  %v45_v18 = vmul.f32 %v36_v10, %v31_v9 }
  0x96   :  { %46 = vst [vmem:[#allocation5] sm:$0xff] %v38_v11  ;;  %47 = vst [vmem:[#allocation5 + $0x8] sm:$0xff] %v39_v12 }
  0x97   :  { %48 = vst [vmem:[#allocation5 + $0x10] sm:$0xff] %v40_v13  ;;  %49 = vst [vmem:[#allocation5 + $0x18] sm:$0xff] %v41_v14 }
  0x98   :  { %50 = vst [vmem:[#allocation5 + $0x20] sm:$0xff] %v42_v15  ;;  %51 = vst [vmem:[#allocation5 + $0x28] sm:$0xff] %v43_v16 }
  0x99   :  { %52 = vst [vmem:[#allocation5 + $0x30] sm:$0xff] %v44_v17  ;;  %53 = vst [vmem:[#allocation5 + $0x38] sm:$0xff] %v45_v18 }
  0x9a   :  { %106 = shalt.err (!%p103_p12)
}
  0x9b   :  { %s107_s26 = scalar_lea.hbm %s168_s2, 1024 }
  0x9c   :  { %p108_p13 = scmp.ne.s32.totalorder %s168_s2, %s107_s26  ;;  %p111_p0 = scmp.lt.u32.totalorder %s107_s26, %s168_s2 }
  0x9e   :  { %p113_p1 = pnand %p111_p0, %p108_p13 }
  0xa0   :  { %116 = shalt.err (!%p113_p1)
}
  0xa1   :  { %63 = dma.vmem_to_hbm [thread:$0]  %s61_s24, 1024, %s168_s2, [#allocation4]  }
  0xa2   :  { %119 = dma.done.wait [#allocation4], 1024  }
  0xa3   :  { %120 = vsyncadd [#allocation4], 4294966272 }
  0xa4   :  { %67 = vsyncpa [#allocation3], 1 }
  0xa5   :  { %68 = vsyncpa [#allocation4], 1 }

</bundles_post_ra>
